<compile_context>
chip_gen: v6e
topology: v6e:2x2x1
jax: 0.10.0
libtpu: 0.0.40
codegen_flags: <defaults>
</compile_context>

<pallas_src>
import functools

import jax
import jax.numpy as jnp
from jax.experimental import pallas as pl
from jax.experimental.pallas import tpu as pltpu

LANES = 128       # TPU lane width: output is padded to this for lane-dense stores.
SUBLANES = 8      # f32 sublane granularity for batch tiles.
NEG_BIG = -1e30   # bias for padded action columns -> exp() underflows to exactly 0.


def _round_up(x, m):
    return ((x + m - 1) // m) * m


def pnetwork_kernel(x_ref, w1_ref, b1_ref, w2_ref, b2_ref, w3_ref, b3_ref, o_ref):
    # x_ref: (TB, state_dim) bf16; w*_ref: bf16 (in, out); b*_ref: (1, out) f32.
    x = x_ref[...]

    # fc1 + relu  (MXU in bf16 with f32 accumulation; elementwise in f32)
    h1 = jnp.dot(x, w1_ref[...], preferred_element_type=jnp.float32) + b1_ref[...]
    h1 = jnp.maximum(h1, 0.0)

    # fc2 + relu
    h2 = jnp.dot(h1.astype(jnp.bfloat16), w2_ref[...],
                 preferred_element_type=jnp.float32) + b2_ref[...]
    h2 = jnp.maximum(h2, 0.0)

    # fc3 (action dim zero-padded to 128 lanes; padded bias columns are -1e30)
    logits = jnp.dot(h2.astype(jnp.bfloat16), w3_ref[...],
                     preferred_element_type=jnp.float32) + b3_ref[...]

    # softmax over the (padded) action axis; padded columns contribute exp(-1e30)=0
    m = jnp.max(logits, axis=-1, keepdims=True)
    e = jnp.exp(logits - m)
    denom = jnp.sum(e, axis=-1, keepdims=True)
    inv = pl.reciprocal(denom, approx=True)        # EUP slot, effectively free
    o_ref[...] = (e * inv).astype(o_ref.dtype)


@functools.partial(jax.jit, static_argnames=("block_b", "vmem_limit_bytes"))
def pnetwork_forward(state, w1, b1, w2, b2, w3, b3, *, block_b=1024,
                     vmem_limit_bytes=None):
    """state: (B, state_dim) f32; w*: (in, out) f32; b*: (1, out) f32."""
    B, state_dim = state.shape
    h2d = w2.shape[1]
    action_dim = w3.shape[1]

    # ---- lane-dense output: pad the action dim up to a multiple of 128 ----
    act_pad = _round_up(action_dim, LANES)
    w3p = jnp.zeros((h2d, act_pad), jnp.float32).at[:, :action_dim].set(w3)
    b3p = jnp.full((1, act_pad), NEG_BIG, jnp.float32).at[:, :action_dim].set(b3)

    # ---- batch tiling: grid over batch, params VMEM-resident across steps ----
    tb = min(_round_up(block_b, SUBLANES), _round_up(B, SUBLANES))
    b_pad = _round_up(B, tb)
    x = state.astype(jnp.bfloat16)
    if b_pad != B:
        x = jnp.pad(x, ((0, b_pad - B), (0, 0)))
    grid = (b_pad // tb,)

    const = lambda a: pl.BlockSpec(a.shape, lambda i: (0,) * a.ndim)

    out = pl.pallas_call(
        pnetwork_kernel,
        out_shape=jax.ShapeDtypeStruct((b_pad, act_pad), jnp.float32),
        grid=grid,
        in_specs=[
            pl.BlockSpec((tb, state_dim), lambda i: (i, 0)),   # pipelined activations
            const(w1), const(b1),                              # params: resident
            const(w2), const(b2),
            const(w3p), const(b3p),
        ],
        out_specs=pl.BlockSpec((tb, act_pad), lambda i: (i, 0)),
        compiler_params=pltpu.CompilerParams(
            dimension_semantics=("parallel",),   # v7x 2-TC / megacore sharding
            vmem_limit_bytes=vmem_limit_bytes,
        ),
    )(x,
      w1.astype(jnp.bfloat16), b1.astype(jnp.float32),
      w2.astype(jnp.bfloat16), b2.astype(jnp.float32),
      w3p.astype(jnp.bfloat16), b3p)

    return out[:B, :action_dim]


# ----------------------------- init helpers -------------------------------
def xavier_uniform(key, in_dim, out_dim):
    # matches nn.init.xavier_uniform_ bound; stored as (in, out) for x @ W
    bound = jnp.sqrt(6.0 / (in_dim + out_dim))
    return jax.random.uniform(key, (in_dim, out_dim), jnp.float32, -bound, bound)


def linear_bias(key, in_dim, out_dim):
    # PyTorch default Linear bias init: U(-1/sqrt(fan_in), 1/sqrt(fan_in))
    bound = 1.0 / jnp.sqrt(jnp.float32(in_dim))
    return jax.random.uniform(key, (1, out_dim), jnp.float32, -bound, bound)


# ----------------------------- references ---------------------------------
def ref_forward_f32(state, w1, b1, w2, b2, w3, b3):
    h1 = jnp.maximum(state @ w1 + b1, 0.0)
    h2 = jnp.maximum(h1 @ w2 + b2, 0.0)
    return jax.nn.softmax(h2 @ w3 + b3, axis=1)


def ref_forward_bf16(state, w1, b1, w2, b2, w3, b3):
    # Same bf16-matmul / f32-elementwise recipe as the kernel.
    bf = jnp.bfloat16
    h1 = jnp.maximum(jnp.dot(state.astype(bf), w1.astype(bf),
                             preferred_element_type=jnp.float32) + b1, 0.0)
    h2 = jnp.maximum(jnp.dot(h1.astype(bf), w2.astype(bf),
                             preferred_element_type=jnp.float32) + b2, 0.0)
    logits = jnp.dot(h2.astype(bf), w3.astype(bf),
                     preferred_element_type=jnp.float32) + b3
    return jax.nn.softmax(logits, axis=1)


if __name__ == "__main__":
    # Small shapes consistent with the module: a flat state vector per sample.
    batch = 8
    state_dim = 8
    hidden_dim1 = 32
    hidden_dim2 = 32
    action_dim = 4

    key = jax.random.PRNGKey(0)
    k_x, k_w1, k_b1, k_w2, k_b2, k_w3, k_b3, k_x2 = jax.random.split(key, 8)

    state = jax.random.normal(k_x, (batch, state_dim), jnp.float32)
    w1 = xavier_uniform(k_w1, state_dim, hidden_dim1)
    b1 = linear_bias(k_b1, state_dim, hidden_dim1)
    w2 = xavier_uniform(k_w2, hidden_dim1, hidden_dim2)
    b2 = linear_bias(k_b2, hidden_dim1, hidden_dim2)
    w3 = xavier_uniform(k_w3, hidden_dim2, action_dim)
    b3 = linear_bias(k_b3, hidden_dim2, action_dim)

    out = jax.block_until_ready(pnetwork_forward(state, w1, b1, w2, b2, w3, b3))

    ref_bf = ref_forward_bf16(state, w1, b1, w2, b2, w3, b3)
    ref_f32 = ref_forward_f32(state, w1, b1, w2, b2, w3, b3)

    assert out.shape == (batch, action_dim)
    # Tight check vs an identical bf16-matmul reference (absorbs approx-reciprocal).
    assert jnp.allclose(out, ref_bf, atol=2e-3, rtol=2e-3)
    # Loose check vs the pure-f32 PyTorch-equivalent math.
    assert jnp.allclose(out, ref_f32, atol=2e-2, rtol=2e-2)
    assert jnp.allclose(jnp.sum(out, axis=1), 1.0, atol=5e-3)

    # Exercise the batch-tiled path (grid > 1, B not a multiple of the tile).
    big_batch = 600
    state_big = jax.random.normal(k_x2, (big_batch, state_dim), jnp.float32)
    out_big = jax.block_until_ready(
        pnetwork_forward(state_big, w1, b1, w2, b2, w3, b3, block_b=256))
    ref_big = ref_forward_bf16(state_big, w1, b1, w2, b2, w3, b3)
    assert out_big.shape == (big_batch, action_dim)
    assert jnp.allclose(out_big, ref_big, atol=2e-3, rtol=2e-3)

    print("KERNEL_OK")
</pallas_src>

<mosaic_0001>
module attributes {stable_mosaic.version = 11 : i64} {
  func.func @pnetwork_kernel(%arg0: i32, %arg1: memref<8x8xbf16, #tpu.memory_space<vmem>>, %arg2: memref<8x32xbf16, #tpu.memory_space<vmem>>, %arg3: memref<1x32xf32, #tpu.memory_space<vmem>>, %arg4: memref<32x32xbf16, #tpu.memory_space<vmem>>, %arg5: memref<1x32xf32, #tpu.memory_space<vmem>>, %arg6: memref<32x128xbf16, #tpu.memory_space<vmem>>, %arg7: memref<1x128xf32, #tpu.memory_space<vmem>>, %arg8: memref<8x128xf32, #tpu.memory_space<vmem>>) attributes {dimension_semantics = [#tpu.dimension_semantics<parallel>], iteration_bounds = array<i64: 1>, scalar_prefetch = 0 : i64, scratch_operands = 0 : i64, tpu.core_type = #tpu.core_type<tc>, window_params = [{transform_indices = @transform_0, window_bounds = array<i64: 8, 8>}, {pipeline_mode = #tpu.pipeline_mode<synchronous>, transform_indices = @transform_1, window_bounds = array<i64: 8, 32>}, {pipeline_mode = #tpu.pipeline_mode<synchronous>, transform_indices = @transform_2, window_bounds = array<i64: 1, 32>}, {pipeline_mode = #tpu.pipeline_mode<synchronous>, transform_indices = @transform_3, window_bounds = array<i64: 32, 32>}, {pipeline_mode = #tpu.pipeline_mode<synchronous>, transform_indices = @transform_4, window_bounds = array<i64: 1, 32>}, {pipeline_mode = #tpu.pipeline_mode<synchronous>, transform_indices = @transform_5, window_bounds = array<i64: 32, 128>}, {pipeline_mode = #tpu.pipeline_mode<synchronous>, transform_indices = @transform_6, window_bounds = array<i64: 1, 128>}, {transform_indices = @transform_7, window_bounds = array<i64: 8, 128>}]} {
    %c0 = arith.constant 0 : index
    %c0_0 = arith.constant 0 : index
    %0 = vector.load %arg1[%c0, %c0_0] : memref<8x8xbf16, #tpu.memory_space<vmem>>, vector<8x8xbf16>
    %c0_1 = arith.constant 0 : index
    %c0_2 = arith.constant 0 : index
    %1 = vector.load %arg2[%c0_1, %c0_2] : memref<8x32xbf16, #tpu.memory_space<vmem>>, vector<8x32xbf16>
    %cst = arith.constant dense<0.000000e+00> : vector<8x32xf32>
    %2 = tpu.matmul %0, %1, %cst {dimension_numbers = #tpu.dot_dimension_numbers<[1], [0], [0], [1], [0, 0, 1, 1], [], []>} : vector<8x8xbf16>, vector<8x32xbf16>, vector<8x32xf32> -> vector<8x32xf32>
    %c0_3 = arith.constant 0 : index
    %c0_4 = arith.constant 0 : index
    %3 = vector.load %arg3[%c0_3, %c0_4] : memref<1x32xf32, #tpu.memory_space<vmem>>, vector<1x32xf32>
    %4 = vector.broadcast %3 : vector<1x32xf32> to vector<8x32xf32>
    %5 = arith.addf %2, %4 : vector<8x32xf32>
    %cst_5 = arith.constant 0.000000e+00 : f32
    %6 = vector.broadcast %cst_5 : f32 to vector<8x32xf32>
    %7 = arith.maximumf %5, %6 : vector<8x32xf32>
    %8 = arith.truncf %7 : vector<8x32xf32> to vector<8x32xbf16>
    %c0_6 = arith.constant 0 : index
    %c0_7 = arith.constant 0 : index
    %9 = vector.load %arg4[%c0_6, %c0_7] : memref<32x32xbf16, #tpu.memory_space<vmem>>, vector<32x32xbf16>
    %cst_8 = arith.constant dense<0.000000e+00> : vector<8x32xf32>
    %10 = tpu.matmul %8, %9, %cst_8 {dimension_numbers = #tpu.dot_dimension_numbers<[1], [0], [0], [1], [0, 0, 1, 1], [], []>} : vector<8x32xbf16>, vector<32x32xbf16>, vector<8x32xf32> -> vector<8x32xf32>
    %c0_9 = arith.constant 0 : index
    %c0_10 = arith.constant 0 : index
    %11 = vector.load %arg5[%c0_9, %c0_10] : memref<1x32xf32, #tpu.memory_space<vmem>>, vector<1x32xf32>
    %12 = vector.broadcast %11 : vector<1x32xf32> to vector<8x32xf32>
    %13 = arith.addf %10, %12 : vector<8x32xf32>
    %cst_11 = arith.constant 0.000000e+00 : f32
    %14 = vector.broadcast %cst_11 : f32 to vector<8x32xf32>
    %15 = arith.maximumf %13, %14 : vector<8x32xf32>
    %16 = arith.truncf %15 : vector<8x32xf32> to vector<8x32xbf16>
    %c0_12 = arith.constant 0 : index
    %c0_13 = arith.constant 0 : index
    %17 = vector.load %arg6[%c0_12, %c0_13] : memref<32x128xbf16, #tpu.memory_space<vmem>>, vector<32x128xbf16>
    %cst_14 = arith.constant dense<0.000000e+00> : vector<8x128xf32>
    %18 = tpu.matmul %16, %17, %cst_14 {dimension_numbers = #tpu.dot_dimension_numbers<[1], [0], [0], [1], [0, 0, 1, 1], [], []>} : vector<8x32xbf16>, vector<32x128xbf16>, vector<8x128xf32> -> vector<8x128xf32>
    %c0_15 = arith.constant 0 : index
    %c0_16 = arith.constant 0 : index
    %19 = vector.load %arg7[%c0_15, %c0_16] : memref<1x128xf32, #tpu.memory_space<vmem>>, vector<1x128xf32>
    %20 = vector.broadcast %19 : vector<1x128xf32> to vector<8x128xf32>
    %21 = arith.addf %18, %20 : vector<8x128xf32>
    %cst_17 = arith.constant dense<0xFF800000> : vector<8xf32>
    %22 = vector.multi_reduction <maximumf>, %21, %cst_17 [1] : vector<8x128xf32> to vector<8xf32>
    %23 = vector.shape_cast %22 : vector<8xf32> to vector<8x1xf32>
    %24 = vector.broadcast %23 : vector<8x1xf32> to vector<8x128xf32>
    %25 = arith.subf %21, %24 : vector<8x128xf32>
    %26 = math.exp %25 : vector<8x128xf32>
    %cst_18 = arith.constant dense<0.000000e+00> : vector<8xf32>
    %27 = vector.multi_reduction <add>, %26, %cst_18 [1] : vector<8x128xf32> to vector<8xf32>
    %28 = vector.shape_cast %27 : vector<8xf32> to vector<8x1xf32>
    %29 = tpu.reciprocal %28 {approx = true} : vector<8x1xf32> -> vector<8x1xf32>
    %30 = vector.broadcast %29 : vector<8x1xf32> to vector<8x128xf32>
    %31 = arith.mulf %26, %30 : vector<8x128xf32>
    %c0_19 = arith.constant 0 : index
    %c0_20 = arith.constant 0 : index
    %32 = vector.load %arg8[%c0_19, %c0_20] : memref<8x128xf32, #tpu.memory_space<vmem>>, vector<8x128xf32>
    tpu.vector_store %arg8[%c0_19, %c0_20], %31 {strides = array<i32>} : memref<8x128xf32, #tpu.memory_space<vmem>>, vector<8x128xf32>,
    return
  }
  func.func @transform_0(%arg0: i32) -> (i32, i32) {
    %c0_i32 = arith.constant 0 : i32
    %c0_i32_0 = arith.constant 0 : i32
    return %arg0, %c0_i32 : i32, i32
  }
  func.func @transform_1(%arg0: i32) -> (i32, i32) {
    %c0_i32 = arith.constant 0 : i32
    %c0_i32_0 = arith.constant 0 : i32
    %c0_i32_1 = arith.constant 0 : i32
    return %c0_i32, %c0_i32_0 : i32, i32
  }
  func.func @transform_2(%arg0: i32) -> (i32, i32) {
    %c0_i32 = arith.constant 0 : i32
    %c0_i32_0 = arith.constant 0 : i32
    %c0_i32_1 = arith.constant 0 : i32
    return %c0_i32, %c0_i32_0 : i32, i32
  }
  func.func @transform_3(%arg0: i32) -> (i32, i32) {
    %c0_i32 = arith.constant 0 : i32
    %c0_i32_0 = arith.constant 0 : i32
    %c0_i32_1 = arith.constant 0 : i32
    return %c0_i32, %c0_i32_0 : i32, i32
  }
  func.func @transform_4(%arg0: i32) -> (i32, i32) {
    %c0_i32 = arith.constant 0 : i32
    %c0_i32_0 = arith.constant 0 : i32
    %c0_i32_1 = arith.constant 0 : i32
    return %c0_i32, %c0_i32_0 : i32, i32
  }
  func.func @transform_5(%arg0: i32) -> (i32, i32) {
    %c0_i32 = arith.constant 0 : i32
    %c0_i32_0 = arith.constant 0 : i32
    %c0_i32_1 = arith.constant 0 : i32
    return %c0_i32, %c0_i32_0 : i32, i32
  }
  func.func @transform_6(%arg0: i32) -> (i32, i32) {
    %c0_i32 = arith.constant 0 : i32
    %c0_i32_0 = arith.constant 0 : i32
    %c0_i32_1 = arith.constant 0 : i32
    return %c0_i32, %c0_i32_0 : i32, i32
  }
  func.func @transform_7(%arg0: i32) -> (i32, i32) {
    %c0_i32 = arith.constant 0 : i32
    %c0_i32_0 = arith.constant 0 : i32
    return %arg0, %c0_i32 : i32, i32
  }
}

</mosaic_0001>

<bundles_post_ra>
// kernel: pnetwork_forward.1
= control target key start
LH: loop header
LB: loop body
LE: loop exit
PB: predicated region body
PF: predicated region fallthrough
CT: control target
= control target key end

     0   :  { %vm40_vm0 = vcmask 1043456   ;;  %v285_v0 = vmov 0.0   ;;  %vm286_vm1 = vmmov 0   ;;  %vm36_vm2 = vcmask 64512   ;;  %s357_s1 = inlined_call_operand.vmem [shape: bf16[8,32], index: 1, kind: input, shape index: {}]   ;;  %s358_s0 = inlined_call_operand.vmem [shape: bf16[8,8], index: 0, kind: input, shape index: {}]   ;;  %s359_s3 = inlined_call_operand.vmem [shape: bf16[32,32], index: 3, kind: input, shape index: {}]   ;;  %s360_s5 = inlined_call_operand.vmem [shape: bf16[32,128], index: 5, kind: input, shape index: {}]   ;;  %s361_s2 = inlined_call_operand.vmem [shape: f32[1,32], index: 2, kind: input, shape index: {}]   ;;  %s362_s4 = inlined_call_operand.vmem [shape: f32[1,32], index: 4, kind: input, shape index: {}]   ;;  %s363_s6 = inlined_call_operand.vmem [shape: f32[1,128], index: 6, kind: input, shape index: {}]   ;;  %s364_s7 = inlined_call_operand.vmem [shape: f32[8,128], index: 7, kind: output, shape index: {}]  }
   0x1   :  { %253 = vmatprep.subr.bf16.mxu0 %v285_v0  ;;  %v28_v1 = vld [vmem:[%s357_s1] sm:$0xf]  ;;  %255 = vmatprep.mubr.msk.bf16.mxu0 %vm286_vm1, %v285_v0  ;;  %v277_v4 = vld [vmem:[%s359_s3 + $0x8] sm:$0xff]   ;;  %vm109_vm3 = vcmask 261120  }
   0x2   :  { %v42_v2 = vsel %vm40_vm0, %v28_v1, 0  ;;  %259 = vmatprep.subr.bf16.mxu1 %v285_v0  ;;  %263 = vmatprep.mubr.msk.bf16.mxu1 %vm286_vm1, %v285_v0  ;;  %v27_v3 = vld [vmem:[%s358_s0] sm:$0xf]  ;;  %v279_v6 = vld [vmem:[%s360_s5 + $0x8] sm:$0xff]  }
   0x3   :  { %254 = vmatpush3.bf16.msra.mxu0 %v42_v2  ;;  %260 = vmatpush3.bf16.msra.mxu1 %v277_v4  ;;  %v278_v5 = vld [vmem:[%s359_s3] sm:$0xff]  }
   0x4   :  { %267 = vmatprep.subr.bf16.mxu0 %v285_v0  ;;  %261 = vmatprep.subr.bf16.mxu1 %v285_v0  ;;  %v235_v7 = vld [vmem:[%s361_s2] ss:$0 sm:$0xff] }
   0x5   :  { %v280_v15 = vld [vmem:[%s360_s5] sm:$0xff]  }
   0x6   :  { %256 = vmatmul.mubr.msk.bf16.vlgmr.msra.gmra.mxu0 %vm36_vm2, %v27_v3  ;;  %v237_v16 = vld [vmem:[%s362_s4] ss:$0 sm:$0xff] }
   0x7   :  { %271 = vmatprep.mubr.msk.bf16.mxu0 %vm286_vm1, %v285_v0  ;;  %262 = vmatpush3.bf16.msra.mxu1 %v278_v5  ;;  %v241_v24 = vld [vmem:[%s363_s6] ss:$0 sm:$0xff] }
   0x8   :  { %268 = vmatpush3.bf16.msra.mxu0 %v279_v6 }
   0x9   :  { %269 = vmatprep.subr.bf16.mxu0 %v285_v0 }
   0xc   :  { %270 = vmatpush3.bf16.msra.mxu0 %v280_v15 }
  0xc6   :  { %v78_v8 = vpop.f32.mrf.mxu0 }
  0xc7   :  { %v79_v9 = vadd.f32 %v235_v7, %v78_v8 }
  0xc8   :  { %v257_v10 = vpop.f32.mrf.mxu0 }
  0xc9   :  { %v84_v11 = vmax.f32 %v79_v9, 0.0 }
  0xca   :  { %v81_v12 = vpop.f32.mrf.mxu0 }
  0xcb   :  { %v85_v13 = vpack.c.bf16 %v84_v11, %v84_v11 }
  0xcc   :  { %v258_v14 = vpop.f32.mrf.mxu0 }
  0xcd   :  { %264 = vmatmul.mubr.msk.bf16.vlgmr.msra.gmra.mxu1 %vm109_vm3, %v85_v13 }
 0x18d   :  { %v147_v17 = vpop.f32.mrf.mxu1 }
 0x18e   :  { %v148_v18 = vadd.f32 %v237_v16, %v147_v17 }
 0x18f   :  { %v265_v19 = vpop.f32.mrf.mxu1 }
 0x190   :  { %v153_v20 = vmax.f32 %v148_v18, 0.0 }
 0x191   :  { %v150_v21 = vpop.f32.mrf.mxu1 }
 0x192   :  { %v154_v22 = vpack.c.bf16 %v153_v20, %v153_v20 }
 0x193   :  { %v266_v23 = vpop.f32.mrf.mxu1 }
 0x194   :  { %272 = vmatmul.mubr.msk.bf16.vlgmr.msra.gmra.mxu0 %vm109_vm3, %v154_v22 }
 0x254   :  { %v215_v25 = vpop.f32.mrf.mxu0 }
 0x255   :  { %v216_v26 = vadd.f32 %v241_v24, %v215_v25 }
 0x256   :  { %v273_v27 = vpop.f32.mrf.mxu0 }
 0x257   :  { %221 = vmax.xlane.f32.xlu0 %v216_v26 }
 0x258   :  { %v218_v28 = vpop.f32.mrf.mxu0 }
 0x25a   :  { %v274_v29 = vpop.f32.mrf.mxu0 }
 0x2e0   :  { %v222_v30 = vpop.xlane.xlu0 %221 }
 0x2e1   :  { %v223_v31 = vsub.f32 %v216_v26, %v222_v30 }
 0x2e3   :  { %v224_v32 = vmul.f32 1.442695, %v223_v31 }
 0x2e5   :  { %281 = vpow2.f32 %v224_v32 }
 0x2f2   :  { %v282_v33 = vpop.eup %281 }
 0x2f3   :  { %226 = vadd.xlane.f32.xlu0 %v282_v33 }
 0x37c   :  { %v227_v34 = vpop.xlane.xlu0 %226 }
 0x37d   :  { %283 = vrcp.f32 %v227_v34 }
 0x38a   :  { %v284_v35 = vpop.eup %283 }
 0x38b   :  { %v229_v36 = vmul.f32 %v284_v35, %v282_v33 }
 0x38d   :  { %230 = vst [vmem:[%s364_s7] sm:$0xff] %v229_v36 }

</bundles_post_ra>
